<compile_context>
chip_gen: v7x
topology: tpu7x:2x2x1
jax: 0.10.0
libtpu: 0.0.40
codegen_flags: <defaults>
</compile_context>

<pallas_src>
import jax
import jax.numpy as jnp
from jax import lax
from jax.experimental import pallas as pl
from jax.experimental.pallas import tpu as pltpu


def _weight_reg_kernel(w_ref, wn_ref, norms_ref):
    """Per-row L2 normalization + per-row norms for one (tile_n, emb) tile."""
    # Pass 1: squared row norms.  The upcast tile feeds only this reduction, so
    # Mosaic can fuse load -> square -> accumulate per vreg (no live f32 tile).
    x = w_ref[...].astype(jnp.float32)
    row_sq = jnp.sum(x * x, axis=1, keepdims=True)                 # (tile_n, 1)

    # 1 / max(||w||, 1e-12)  ==  rsqrt(max(||w||^2, 1e-24))   (EUP, free slot).
    inv = lax.rsqrt(jnp.maximum(row_sq, 1e-24))

    # Pass 2: re-read the tile and scale (broadcast multiply, lane-dense store).
    wn_ref[...] = (w_ref[...].astype(jnp.float32) * inv).astype(wn_ref.dtype)

    # torch.norm(normalized, dim=1) == ||w|| / max(||w||, 1e-12); algebraically
    # identical, avoids a second tile-wide multiply + reduce + sqrt.
    norms_ref[...] = jnp.sqrt(row_sq) * inv


def _choose_tile_n(num_classes, emb, itemsize, *,
                   target_tile_bytes=2 << 20, min_grid_steps=8):
    """Row-tile size: ~2 MiB input tiles, >= min_grid_steps grid steps when the
    row count allows it, and a multiple of 8 (sublane constraint)."""
    if num_classes <= 8:
        return num_classes                    # full dim satisfies the layout rule
    rows_by_bytes = max(8, target_tile_bytes // max(emb * itemsize, 1))
    rows_by_grid = max(8, pl.cdiv(num_classes, min_grid_steps))
    tile_n = min(rows_by_bytes, rows_by_grid)
    return max(8, (tile_n // 8) * 8)


def base_weight_regularizer_forward(weights, *, normalize_weights=True):
    """Returns (loss, avg_weight_norm, weight_norms, normalized_weights)."""
    num_classes, emb = weights.shape
    # TODO(synk): normalize_weights=False (skip the divide) is not wired into
    # the kernel; only the module's default (True) path is implemented.
    assert normalize_weights, "only normalize_weights=True is implemented"

    itemsize = jnp.dtype(weights.dtype).itemsize
    tile_n = _choose_tile_n(num_classes, emb, itemsize)
    grid_n = pl.cdiv(num_classes, tile_n)     # ragged last block is clipped

    # VMEM: double-buffered input + wn-output tiles, double-buffered norms
    # column (padded to 128 lanes), plus the in-kernel f32 upcast temporaries.
    tile_io_bytes = tile_n * emb * itemsize
    tile_f32_bytes = tile_n * emb * 4
    norms_buf_bytes = tile_n * 128 * 4
    vmem_needed = (4 * tile_io_bytes + 2 * norms_buf_bytes
                   + 2 * tile_f32_bytes + (2 << 20))
    # ~2 MiB tiles keep this well under v7x's 64 MiB physical VMEM; the 24 MiB
    # floor only lifts v5e's 16 MiB default scoped limit for bf16 inputs.
    vmem_limit = int(max(vmem_needed, 24 << 20))

    wn, norms_col = pl.pallas_call(
        _weight_reg_kernel,
        out_shape=(
            jax.ShapeDtypeStruct((num_classes, emb), weights.dtype),  # normalized W
            jax.ShapeDtypeStruct((num_classes, 1), jnp.float32),      # per-row norms
        ),
        grid_spec=pltpu.PrefetchScalarGridSpec(
            num_scalar_prefetch=0,
            grid=(grid_n,),
            in_specs=[pl.BlockSpec((tile_n, emb), lambda i: (i, 0))],
            out_specs=(
                pl.BlockSpec((tile_n, emb), lambda i: (i, 0)),
                pl.BlockSpec((tile_n, 1), lambda i: (i, 0)),
            ),
        ),
        compiler_params=pltpu.CompilerParams(
            dimension_semantics=("parallel",),   # no cross-tile state -> megacore OK
            vmem_limit_bytes=vmem_limit,
        ),
    )(weights)

    weight_norms = norms_col[:, 0]
    avg_weight_norm = jnp.mean(weight_norms)
    # Base-class compute_loss is abstract -> loss falls back to
    # torch.sum(weights * 0) == 0.  Hard-coded (skips the provably-dead
    # tile-wide multiply); only differs from the reference if weights hold NaN.
    loss = jnp.zeros((), dtype=jnp.float32)
    return loss, avg_weight_norm, weight_norms, wn


def _reference(weights):
    w = weights.astype(jnp.float32)
    norm = jnp.sqrt(jnp.sum(w * w, axis=1, keepdims=True))
    wn = w / jnp.maximum(norm, 1e-12)
    weight_norms = jnp.sqrt(jnp.sum(wn * wn, axis=1))
    return jnp.sum(wn * 0.0), jnp.mean(weight_norms), weight_norms, wn


def _check(weights):
    loss, avg, norms, wn = base_weight_regularizer_forward(weights)
    jax.block_until_ready((loss, avg, norms, wn))
    ref_loss, ref_avg, ref_norms, ref_wn = _reference(weights)
    assert wn.shape == weights.shape and norms.shape == (weights.shape[0],)
    assert jnp.allclose(wn.astype(jnp.float32), ref_wn, atol=1e-5), "normalized weights mismatch"
    assert jnp.allclose(norms, ref_norms, atol=1e-5), "weight_norms mismatch"
    assert jnp.allclose(avg, ref_avg, atol=1e-5), "avg_weight_norm mismatch"
    assert jnp.allclose(loss, ref_loss, atol=1e-6), "loss mismatch"


if __name__ == "__main__":
    key = jax.random.PRNGKey(0)
    k1, k2, k3 = jax.random.split(key, 3)

    # Small (num_classes, embedding_size) consistent with the module.
    w_small = jax.random.normal(k1, (16, 32), dtype=jnp.float32)
    _check(w_small)

    # Ragged row count: exercises the cdiv grid + clipped last block path
    # (tile_n=16 -> grid=(9,), last block only partially valid).
    w_ragged = jax.random.normal(k2, (130, 64), dtype=jnp.float32)
    _check(w_ragged)

    # Enough rows for the >= 8-step pipelined grid (tile_n=64 -> grid=(8,)).
    w_medium = jax.random.normal(k3, (512, 128), dtype=jnp.float32)
    _check(w_medium)

    print("KERNEL_OK")
</pallas_src>

<mosaic_0001>
module attributes {stable_mosaic.version = 11 : i64} {
  func.func @_weight_reg_kernel(%arg0: i32, %arg1: memref<8x32xf32, #tpu.memory_space<vmem>>, %arg2: memref<8x32xf32, #tpu.memory_space<vmem>>, %arg3: memref<8x1xf32, #tpu.memory_space<vmem>>) attributes {dimension_semantics = [#tpu.dimension_semantics<parallel>], iteration_bounds = array<i64: 2>, scalar_prefetch = 0 : i64, scratch_operands = 0 : i64, tpu.core_type = #tpu.core_type<tc>, window_params = [{transform_indices = @transform_0, window_bounds = array<i64: 8, 32>}, {transform_indices = @transform_1, window_bounds = array<i64: 8, 32>}, {transform_indices = @transform_2, window_bounds = array<i64: 8, 1>}]} {
    %c0 = arith.constant 0 : index
    %c0_0 = arith.constant 0 : index
    %0 = vector.load %arg1[%c0, %c0_0] : memref<8x32xf32, #tpu.memory_space<vmem>>, vector<8x32xf32>
    %1 = arith.mulf %0, %0 : vector<8x32xf32>
    %cst = arith.constant dense<0.000000e+00> : vector<8xf32>
    %2 = vector.multi_reduction <add>, %1, %cst [1] : vector<8x32xf32> to vector<8xf32>
    %3 = vector.shape_cast %2 : vector<8xf32> to vector<8x1xf32>
    %cst_1 = arith.constant 1.000000e-24 : f32
    %4 = vector.broadcast %cst_1 : f32 to vector<8x1xf32>
    %5 = arith.maximumf %3, %4 : vector<8x1xf32>
    %6 = math.rsqrt %5 : vector<8x1xf32>
    %c0_2 = arith.constant 0 : index
    %c0_3 = arith.constant 0 : index
    %7 = vector.load %arg1[%c0_2, %c0_3] : memref<8x32xf32, #tpu.memory_space<vmem>>, vector<8x32xf32>
    %8 = vector.broadcast %6 : vector<8x1xf32> to vector<8x32xf32>
    %9 = arith.mulf %7, %8 : vector<8x32xf32>
    %c0_4 = arith.constant 0 : index
    %c0_5 = arith.constant 0 : index
    %10 = vector.load %arg2[%c0_4, %c0_5] : memref<8x32xf32, #tpu.memory_space<vmem>>, vector<8x32xf32>
    tpu.vector_store %arg2[%c0_4, %c0_5], %9 {strides = array<i32>} : memref<8x32xf32, #tpu.memory_space<vmem>>, vector<8x32xf32>,
    %11 = math.sqrt %3 : vector<8x1xf32>
    %12 = arith.mulf %11, %6 : vector<8x1xf32>
    %c0_6 = arith.constant 0 : index
    %c0_7 = arith.constant 0 : index
    %13 = vector.load %arg3[%c0_6, %c0_7] : memref<8x1xf32, #tpu.memory_space<vmem>>, vector<8x1xf32>
    tpu.vector_store %arg3[%c0_6, %c0_7], %12 {strides = array<i32>} : memref<8x1xf32, #tpu.memory_space<vmem>>, vector<8x1xf32>,
    return
  }
  func.func @transform_0(%arg0: i32) -> (i32, i32) {
    %c0_i32 = arith.constant 0 : i32
    %c0_i32_0 = arith.constant 0 : i32
    return %arg0, %c0_i32 : i32, i32
  }
  func.func @transform_1(%arg0: i32) -> (i32, i32) {
    %c0_i32 = arith.constant 0 : i32
    %c0_i32_0 = arith.constant 0 : i32
    return %arg0, %c0_i32 : i32, i32
  }
  func.func @transform_2(%arg0: i32) -> (i32, i32) {
    %c0_i32 = arith.constant 0 : i32
    %c0_i32_0 = arith.constant 0 : i32
    return %arg0, %c0_i32 : i32, i32
  }
}

</mosaic_0001>

<bundles_post_ra>
// kernel: tpu_custom_call.1
= control target key start
LH: loop header
LB: loop body
LE: loop exit
PB: predicated region body
PF: predicated region fallthrough
CT: control target
= control target key end

     0   :  { %8 = vsyncpa [#allocation3], 0  ;;  %s655_s0 = inlined_call_operand.hbm [shape: f32[16,32], index: 0, kind: input, shape index: {}]   ;;  %s656_s1 = inlined_call_operand.hbm [shape: f32[16,32], index: 1, kind: output, shape index: {0}]   ;;  %s657_s2 = inlined_call_operand.vmem [shape: f32[16,1], index: 2, kind: output, shape index: {1}]  }
   0x1   :  { %10 = vsyncpa [#allocation3 + $0x1], 0 }
   0x2   :  { %11 = vsyncpa [#allocation4], 0 }
   0x3   :  { %13 = vsyncpa [#allocation4 + $0x1], 0  ;;  %s483_s9 = smov 0   ;;  %s485_s10 = smov 0  }
   0x4   :  { %s487_s11 = smov 0   ;;  %s489_s12 = smov 0  }
   0x5 LB: > { %s504_s13 = sadd.s32 4294967295, %s464_s12   ;;  %s305_s14 = sadd.s32 4294967294, %s464_s12   ;;  %s464_s12 = sphi %s489_s12, %s672_s12   ;;  %s460_s11 = sphi %s487_s11, %s671_s11   ;;  %s456_s10 = sphi %s485_s10, %s670_s10   ;;  %s452_s9 = sphi %s483_s9, %s669_s9  }
   0x6   : > { %s508_s15 = sadd.s32 1, %s464_s12   ;;  %s26_s16 = sadd.s32 1, %s460_s11 }
   0x7   : > { %s23_s17 = ssub.s32 %s464_s12, %s508_s15  ;;  %p33_p0 = scmp.ne.s32.totalorder %s460_s11, %s456_s10 }
   0x8   : > { %p24_p1 = scmp.eq.s32.totalorder %s23_s17, 0  ;;  %p34_p2 = scmp.eq.s32.totalorder %s464_s12, 0 }
   0x9   : > { %p39_p3 = scmp.ne.s32.totalorder %s456_s10, %s452_s9  ;;  %p40_p4 = scmp.eq.s32.totalorder %s504_s13, 0 }
   0xa   : > { %s520_s18 = scalar_select %p24_p1, %s460_s11, %s26_s16  }
   0xb   : > { %p522_p5 = por %p34_p2, %p33_p0  ;;  %p526_p6 = por %p40_p4, %p39_p3 }
   0xc   : > { %p63_p7 = scmp.eq.s32.totalorder %s504_s13, 1  ;;  %p69_p8 = scmp.eq.s32.totalorder %s305_s14, 1 }
   0xd   : > { %p330_p10 = scmp.lt.s32.totalorder %s464_s12, 2  ;;  %s115_s23 = sand.u32 1, %s460_s11  }
   0xe   : > { %p533_p11 = por %p63_p7, %p33_p0  ;;  %p537_p12 = por %p69_p8, %p39_p3 }
   0xf   : > { %s309_s24 = sshll.u32 %s464_s12, 7  ;;  %s308_s25 = sshll.u32 %s115_s23, 3 }
  0x10   : > { %s661_s21 = scalar_select %p533_p11, 1, 0 }
  0x11   : > { %s662_s22 = scalar_select %p537_p12, 1, 0 }
  0x12   : > { %s546_s28 = scalar_lea.hbm %s655_s0, %s309_s24  ;;  %s119_s29 = scalar_lea.vmem [#allocation2], %s308_s25 }
  0x13   : > { %s126_s30 = sshll.u32 %s119_s29, 4  ;;  %p550_p13 = pnand %p330_p10, %p522_p5  ;;  %s554_s30 = int_to_ptr.vmem [resolvable:$true] %s126_s30 }
  0x14   : > { %s116_s4 = scalar_lea.sflag [#allocation3], %s115_s23  ;;  %s368_s5 = scalar_lea.hbm %s546_s28, 128 }
  0x15   : > { %p369_p2 = scmp.ne.s32.totalorder %s546_s28, %s368_s5  ;;  %p370_p3 = pneg %p550_p13 }
  0x16   : > { %s373_s8 = scalar_lea.hbm %s655_s0, 256  ;;  %p374_p5 = scmp.lt.u32.totalorder %s546_s28, %s655_s0 }
  0x17   : > { %p371_p4 = pnand %p370_p3, %p369_p2  ;;  %p375_p8 = scmp.lt.u32.totalorder %s373_s8, %s368_s5 }
  0x18   : > { %p377_p9 = scmp.lt.u32.totalorder %s368_s5, %s546_s28 }
  0x19   : > { %p372_p7 = pneg %p371_p4  ;;  %p376_p10 = por %p375_p8, %p374_p5 }
  0x1b   : > { %p378_p0 = por %p377_p9, %p376_p10 }
  0x1d   : > { %p379_p1 = pnand %p378_p0, %p372_p7 }
  0x1f   : > { %382 = shalt.err (!%p379_p1)
}
  0x20   : > { %s383_s17 = scalar_lea.vmem %s554_s30, 128  ;;  %s466_s19 = smov [#allocation2]  }
  0x21   : > { %p384_p2 = scmp.ne.s32.totalorder %s554_s30, %s383_s17  ;;  %s388_s23 = sshll.u32 %s466_s19, 4  ;;  %s389_s23 = int_to_ptr.vmem [resolvable:$false] %s388_s23 }
  0x22   : > { %s390_s24 = scalar_lea.vmem %s389_s23, 256  ;;  %p391_p11 = scmp.lt.s32.totalorder %s554_s30, %s389_s23 }
  0x23   : > { %p386_p4 = pnand %p384_p2, %p370_p3  ;;  %p392_p5 = scmp.lt.s32.totalorder %s390_s24, %s383_s17 }
  0x25   : > { %p387_p12 = pneg %p386_p4  ;;  %p393_p8 = por %p392_p5, %p391_p11 }
  0x27   : > { %p394_p9 = pnand %p393_p8, %p387_p12 }
  0x29   : > { %397 = shalt.err (!%p394_p9)
}
  0x2a   : > { %325 = dma.hbm_to_vmem [thread:$0]  (!%p550_p13), %s546_s28, 128, %s554_s30, %s116_s4  }
  0x2b   : > { %p664_p0 = scmp.lt.s32.totalorder %s464_s12, 3  ;;  %p665_p1 = scmp.ge.s32.totalorder %s464_s12, 1 }
  0x2d   : > { %p132_p3 = pnand %p665_p1, %p664_p0 }
  0x2e   : > { %s588_s25 = sand.u32 (!%p132_p3), 1, %s456_s10  }
  0x2f   : > { %135 = sbr.rel (%p132_p3) target bundleno = 230 (0xe6), region = 24  ;;  %s311_s26 = sshll.u32 (!%p132_p3), %s588_s25, 3 }
  0x30   : > { %s138_s27 = scalar_lea.sflag (!%p132_p3), [#allocation3], %s588_s25  ;;  %s141_s29 = scalar_lea.vmem (!%p132_p3), [#allocation2], %s311_s26 }
  0x36   : > { %443 = dma.done.wait (%p526_p6), %s138_s27, 128  }
  0x37   : > { %445 = vsyncadd (%p526_p6), %s138_s27, 4294967168  ;;  %v170_v0 = vld [vmem:[%s141_s29] sm:$0xff]  ;;  %vm172_vm0 = vcmask 261120   ;;  %p166_p11 = scmp.lt.s32.totalorder %s504_s13, 1  ;;  %s315_s30 = sshll.u32 %s504_s13, 7  ;;  %vm188_vm3 = vcmask 7168  }
  0x38   : > { %v171_v1 = vmul.f32 %v170_v0, %v170_v0  ;;  %s159_s3 = scalar_lea.vmem [#allocation5], %s311_s26  ;;  %s603_s7 = scalar_lea.hbm %s656_s1, %s315_s30 }
  0x39   : > { %s167_s28 = scalar_select %p166_p11, %s504_s13, 1 }
  0x3a   : > { %v173_v2 = vsel %vm172_vm0, %v171_v1, 0.0  ;;  %s208_s20 = sshll.u32 %s159_s3, 4  ;;  %s191_s16 = scalar_lea.sflag [#allocation4], %s588_s25  ;;  %s605_s20 = int_to_ptr.vmem [resolvable:$true] %s208_s20 }
  0x3b   : > { %174 = vadd.xlane.f32.xlu0 %v173_v2  ;;  %s313_s4 = sshll.u32 %s167_s28, 3  ;;  %s398_s17 = scalar_lea.vmem %s605_s20, 128 }
  0x3c   : > { %s610_s14 = scalar_lea.vmem %s657_s2, %s313_s4  ;;  %p399_p6 = scmp.ne.s32.totalorder %s605_s20, %s398_s17 }
  0x3d   : > { %p666_p12 = scmp.ne.s32.totalorder %s661_s21, 0  ;;  %s467_s19 = smov [#allocation5]  }
  0x3e   : > { %s402_s23 = sshll.u32 %s467_s19, 4  ;;  %s403_s23 = int_to_ptr.vmem [resolvable:$false] %s402_s23 }
  0x3f   : > { %p400_p13 = pnand %p399_p6, %p666_p12  ;;  %s404_s24 = scalar_lea.vmem %s403_s23, 256 }
  0x40   : > { %p405_p10 = scmp.lt.s32.totalorder %s605_s20, %s403_s23  ;;  %p406_p2 = scmp.lt.s32.totalorder %s404_s24, %s398_s17 }
  0x41   : > { %p401_p7 = pneg %p400_p13 }
  0x42   : > { %p407_p4 = por %p406_p2, %p405_p10 }
  0x44   : > { %p408_p5 = pnand %p407_p4, %p401_p7 }
  0xc8   : > { %v175_v3 = vpop.xlane.xlu0 %174 }
  0xc9   : > { %v176_v4 = vmax.f32 %v175_v3, 1e-24  ;;  %364 = vrsqrt.f32 %v175_v3  ;;  %vm182_vm1 = vcmp.eq.f32.partialorder %v175_v3, inf  ;;  %v185_v8 = vand.u32 2147483648, %v175_v3 }
  0xca   : > { %vm184_vm2 = vcmp.eq.f32.partialorder %v175_v3, 0.0 }
  0xcb   : > { %366 = vrsqrt.f32 %v176_v4 }
  0xd3   : > { %v365_v5 = vpop.eup %364 }
  0xd4   : > { %v181_v6 = vmul.f32 %v365_v5, %v175_v3 }
  0xd5   : > { %v367_v7 = vpop.eup %366 }
  0xd6   : > { %v183_v9 = vsel %vm182_vm1, %v175_v3, %v181_v6  ;;  %v178_v10 = vmul.f32 %v367_v7, %v170_v0 }
  0xd7   : > { %v186_v11 = vsel %vm184_vm2, %v185_v8, %v183_v9 }
  0xd8   : > { %v187_v12 = vmul.f32 %v367_v7, %v186_v11  ;;  %179 = vst.msk [vmem:[%s159_s3] sm:$0xff] %vm172_vm0, %v178_v10 }
  0xd9   : > { %411 = shalt.err (!%p408_p5)
}
  0xda   : > { %s412_s25 = scalar_lea.hbm %s603_s7, 128  ;;  %s416_s29 = scalar_lea.hbm %s656_s1, 256 }
  0xdb   : > { %p413_p8 = scmp.ne.s32.totalorder %s603_s7, %s412_s25  ;;  %p417_p1 = scmp.lt.u32.totalorder %s603_s7, %s656_s1 }
  0xdc   : > { %p418_p3 = scmp.lt.u32.totalorder %s416_s29, %s412_s25  ;;  %p420_p6 = scmp.lt.u32.totalorder %s412_s25, %s603_s7 }
  0xdd   : > { %p414_p9 = pnand %p413_p8, %p666_p12 }
  0xde   : > { %p419_p11 = por %p418_p3, %p417_p1 }
  0xdf   : > { %p415_p0 = pneg %p414_p9 }
  0xe0   : > { %p421_p13 = por %p420_p6, %p419_p11 }
  0xe2   : > { %p422_p7 = pnand %p421_p13, %p415_p0 }
  0xe4   : > { %425 = shalt.err (!%p422_p7)
}
  0xe5   : > { %320 = dma.vmem_to_hbm [thread:$0]  (%p666_p12), %s605_s20, 128, %s603_s7, %s191_s16   ;;  %189 = vst.msk [vmem:[%s610_s14] sm:$0xff] %vm188_vm3, %v187_v12 }
  0xe6 PF: > { %s223_s3 = sand.u32 1, %s452_s9   ;;  %p667_p10 = scmp.ne.s32.totalorder %s662_s22, 0 }
  0xe7   : > { %p668_p2 = scmp.ge.s32.totalorder %s464_s12, 2  ;;  %s224_s4 = scalar_lea.sflag [#allocation4], %s223_s3 }
  0xe9   : > { %p327_p4 = pnand %p668_p2, %p667_p10 }
  0xeb   : > { %447 = dma.done.wait (!%p327_p4), %s224_s4, 128  }
  0xec   : > { %449 = vsyncadd (!%p327_p4), %s224_s4, 4294967168  ;;  %p16_p5 = scmp.ge.s32.totalorder %s508_s15, 4   ;;  %s669_s9 = smov %s456_s10 }
  0xed   : > { %s670_s10 = smov %s460_s11  ;;  %s671_s11 = smov %s520_s18 }
  0xee   : > { %s672_s12 = smov %s508_s15  ;;  %18 = sbr.rel (!%p16_p5) target bundleno = 5 (0x5), region = 81 }
  0xf5   :  { %236 = vsyncpa [#allocation3], 1 }
  0xf6   :  { %238 = vsyncpa [#allocation3 + $0x1], 1 }
  0xf7   :  { %239 = vsyncpa [#allocation4], 1 }
  0xf8   :  { %241 = vsyncpa [#allocation4 + $0x1], 1 }

</bundles_post_ra>
